<compile_context>
chip_gen: v5e
topology: v5e:2x2
jax: 0.10.0
libtpu: 0.0.40
codegen_flags: <defaults>
</compile_context>

<pallas_src>
import jax
import jax.numpy as jnp
from jax.experimental import pallas as pl
from jax.experimental.pallas import tpu as pltpu


def _round_up(n, m):
    return ((n + m - 1) // m) * m


def value_kernel(x_ref, w1_ref, b1_ref, w2_ref, b2_ref, wh_ref, bh_ref, o_ref):
    # In-kernel bf16 cast of the x tile (hidden under MXU slack; no-op for bf16 x).
    x = x_ref[...].astype(jnp.bfloat16)
    # Layer 1: bf16 MXU matmul, f32 accumulate; bias + ReLU on the VPU.
    h = jnp.dot(x, w1_ref[...], preferred_element_type=jnp.float32)
    h = jnp.maximum(h + b1_ref[...], 0.0)
    # Layer 2: same pattern (re-cast activations to bf16 for the MXU).
    h = jnp.dot(h.astype(jnp.bfloat16), w2_ref[...], preferred_element_type=jnp.float32)
    h = jnp.maximum(h + b2_ref[...], 0.0)
    # Value head: VPU multiply + XLU lane reduction (out_features == 1 -> skip MXU).
    v = jnp.sum(h * wh_ref[...], axis=-1, keepdims=True)
    o_ref[...] = (v + bh_ref[...]).astype(o_ref.dtype)


def value_forward(x, w1, b1, w2, b2, wh, bh, *, block_b=4096):
    """x: (B, state_dim) f32/bf16. Weights stored as (in_features, out_features)."""
    B, S = x.shape
    H1 = w1.shape[1]
    H2 = w2.shape[1]

    # Small, VMEM-resident operands: bf16 weights for the MXU, f32 biases / head.
    w1b = w1.astype(jnp.bfloat16)
    w2b = w2.astype(jnp.bfloat16)
    b1r = b1.reshape(1, H1).astype(jnp.float32)
    b2r = b2.reshape(1, H2).astype(jnp.float32)
    whr = wh.reshape(1, H2).astype(jnp.float32)
    bhr = bh.reshape(1, 1).astype(jnp.float32)

    # Batch tile: as large as block_b allows (amortizes per-step overhead), but
    # capped so large batches keep >= 2 grid steps for v7x's two TensorCores.
    tb = min(block_b, _round_up(B, 8))
    if B > 256:
        tb = min(tb, _round_up(pl.cdiv(B, 2), 128))
    tb = max(tb, 8)
    grid = (pl.cdiv(B, tb),)  # ragged last block handled by Pallas (masked writes)

    def resident(arr):
        # Same block every grid step -> stays in VMEM, no re-DMA.
        return pl.BlockSpec(arr.shape, lambda *_: (0,) * arr.ndim)

    flops = 2 * B * (S * H1 + H1 * H2 + H2)
    bytes_accessed = (
        B * S * x.dtype.itemsize      # x tile traffic (no extra cast/pad passes)
        + B * 4                       # output (f32)
        + (w1b.size + w2b.size) * 2
        + (b1r.size + b2r.size + whr.size + bhr.size) * 4
    )

    out = pl.pallas_call(
        value_kernel,
        out_shape=jax.ShapeDtypeStruct((B, 1), jnp.float32),
        grid_spec=pltpu.PrefetchScalarGridSpec(
            num_scalar_prefetch=0,
            grid=grid,
            in_specs=[
                pl.BlockSpec((tb, S), lambda i: (i, 0)),  # x tile: pipelined
                resident(w1b), resident(b1r),
                resident(w2b), resident(b2r),
                resident(whr), resident(bhr),
            ],
            out_specs=pl.BlockSpec((tb, 1), lambda i: (i, 0)),
        ),
        compiler_params=pltpu.CompilerParams(
            dimension_semantics=("parallel",),  # shard batch steps across TCs (v7x)
        ),
        cost_estimate=pl.CostEstimate(
            flops=flops, transcendentals=0, bytes_accessed=bytes_accessed),
    )(x, w1b, b1r, w2b, b2r, whr, bhr)
    return out


def init_params(key, state_dim, hidden_size=(128, 128)):
    """Mirror torch.nn.Linear default init (uniform +-1/sqrt(fan_in)),
    with value_head.weight * 0.1 and value_head.bias * 0.0."""
    params = []
    last_dim = state_dim
    keys = jax.random.split(key, 2 * (len(hidden_size) + 1))
    ki = 0
    for nh in hidden_size:
        bound = 1.0 / jnp.sqrt(last_dim)
        w = jax.random.uniform(keys[ki], (last_dim, nh), jnp.float32, -bound, bound)
        b = jax.random.uniform(keys[ki + 1], (1, nh), jnp.float32, -bound, bound)
        params.append((w, b))
        last_dim = nh
        ki += 2
    bound = 1.0 / jnp.sqrt(last_dim)
    wh = jax.random.uniform(keys[ki], (last_dim, 1), jnp.float32, -bound, bound) * 0.1
    bh = jnp.zeros((1, 1), jnp.float32)
    return params, (wh, bh)


def _ref_f32(x, params, head):
    h = x
    for w, b in params:
        h = jnp.maximum(h @ w + b, 0.0)
    wh, bh = head
    return h @ wh + bh


def _ref_mixed(x, params, head):
    """Mirror the kernel's bf16-operand / f32-accumulate arithmetic."""
    (w1, b1), (w2, b2) = params
    wh, bh = head
    h = jnp.dot(x.astype(jnp.bfloat16), w1.astype(jnp.bfloat16),
                preferred_element_type=jnp.float32)
    h = jnp.maximum(h + b1, 0.0)
    h = jnp.dot(h.astype(jnp.bfloat16), w2.astype(jnp.bfloat16),
                preferred_element_type=jnp.float32)
    h = jnp.maximum(h + b2, 0.0)
    return jnp.sum(h * wh.reshape(1, -1), axis=-1, keepdims=True) + bh.reshape(1, 1)


if __name__ == "__main__":
    key = jax.random.PRNGKey(0)
    k_x, k_p, k_x2 = jax.random.split(key, 3)

    state_dim = 32
    params, head = init_params(k_p, state_dim)
    (w1, b1), (w2, b2) = params
    wh, bh = head

    # Case 1: tiny batch, single grid step (block exactly covers the batch).
    x = jax.random.normal(k_x, (8, state_dim), jnp.float32)
    v = value_forward(x, w1, b1, w2, b2, wh, bh)
    jax.block_until_ready(v)
    assert v.shape == (8, 1)
    assert jnp.allclose(v, _ref_mixed(x, params, head), atol=2e-3, rtol=2e-3)
    assert jnp.allclose(v, _ref_f32(x, params, head), atol=5e-2, rtol=5e-2)

    # Case 2: batch not divisible by the tile -> exercises the ragged last block
    # (no wrapper pad / slice) + a multi-step "parallel" grid (tb=256, 2 steps).
    x2 = jax.random.normal(k_x2, (300, state_dim), jnp.float32)
    v2 = value_forward(x2, w1, b1, w2, b2, wh, bh)
    jax.block_until_ready(v2)
    assert v2.shape == (300, 1)
    assert jnp.allclose(v2, _ref_mixed(x2, params, head), atol=2e-3, rtol=2e-3)
    assert jnp.allclose(v2, _ref_f32(x2, params, head), atol=5e-2, rtol=5e-2)

    print("KERNEL_OK")
</pallas_src>

<mosaic_0001>
module attributes {stable_mosaic.version = 11 : i64} {
  func.func @value_kernel(%arg0: i32, %arg1: memref<8x32xf32, #tpu.memory_space<vmem>>, %arg2: memref<32x128xbf16, #tpu.memory_space<vmem>>, %arg3: memref<1x128xf32, #tpu.memory_space<vmem>>, %arg4: memref<128x128xbf16, #tpu.memory_space<vmem>>, %arg5: memref<1x128xf32, #tpu.memory_space<vmem>>, %arg6: memref<1x128xf32, #tpu.memory_space<vmem>>, %arg7: memref<1x1xf32, #tpu.memory_space<vmem>>, %arg8: memref<8x1xf32, #tpu.memory_space<vmem>>) attributes {dimension_semantics = [#tpu.dimension_semantics<parallel>], iteration_bounds = array<i64: 1>, scalar_prefetch = 0 : i64, scratch_operands = 0 : i64, tpu.core_type = #tpu.core_type<tc>, window_params = [{transform_indices = @transform_0, window_bounds = array<i64: 8, 32>}, {pipeline_mode = #tpu.pipeline_mode<synchronous>, transform_indices = @transform_1, window_bounds = array<i64: 32, 128>}, {pipeline_mode = #tpu.pipeline_mode<synchronous>, transform_indices = @transform_2, window_bounds = array<i64: 1, 128>}, {pipeline_mode = #tpu.pipeline_mode<synchronous>, transform_indices = @transform_3, window_bounds = array<i64: 128, 128>}, {pipeline_mode = #tpu.pipeline_mode<synchronous>, transform_indices = @transform_4, window_bounds = array<i64: 1, 128>}, {pipeline_mode = #tpu.pipeline_mode<synchronous>, transform_indices = @transform_5, window_bounds = array<i64: 1, 128>}, {pipeline_mode = #tpu.pipeline_mode<synchronous>, transform_indices = @transform_6, window_bounds = array<i64: 1, 1>}, {transform_indices = @transform_7, window_bounds = array<i64: 8, 1>}]} {
    %c0 = arith.constant 0 : index
    %c0_0 = arith.constant 0 : index
    %0 = vector.load %arg1[%c0, %c0_0] : memref<8x32xf32, #tpu.memory_space<vmem>>, vector<8x32xf32>
    %1 = arith.truncf %0 : vector<8x32xf32> to vector<8x32xbf16>
    %c0_1 = arith.constant 0 : index
    %c0_2 = arith.constant 0 : index
    %2 = vector.load %arg2[%c0_1, %c0_2] : memref<32x128xbf16, #tpu.memory_space<vmem>>, vector<32x128xbf16>
    %cst = arith.constant dense<0.000000e+00> : vector<8x128xf32>
    %3 = tpu.matmul %1, %2, %cst {dimension_numbers = #tpu.dot_dimension_numbers<[1], [0], [0], [1], [0, 0, 1, 1], [], []>} : vector<8x32xbf16>, vector<32x128xbf16>, vector<8x128xf32> -> vector<8x128xf32>
    %c0_3 = arith.constant 0 : index
    %c0_4 = arith.constant 0 : index
    %4 = vector.load %arg3[%c0_3, %c0_4] : memref<1x128xf32, #tpu.memory_space<vmem>>, vector<1x128xf32>
    %5 = vector.broadcast %4 : vector<1x128xf32> to vector<8x128xf32>
    %6 = arith.addf %3, %5 : vector<8x128xf32>
    %cst_5 = arith.constant 0.000000e+00 : f32
    %7 = vector.broadcast %cst_5 : f32 to vector<8x128xf32>
    %8 = arith.maximumf %6, %7 : vector<8x128xf32>
    %9 = arith.truncf %8 : vector<8x128xf32> to vector<8x128xbf16>
    %c0_6 = arith.constant 0 : index
    %c0_7 = arith.constant 0 : index
    %10 = vector.load %arg4[%c0_6, %c0_7] : memref<128x128xbf16, #tpu.memory_space<vmem>>, vector<128x128xbf16>
    %cst_8 = arith.constant dense<0.000000e+00> : vector<8x128xf32>
    %11 = tpu.matmul %9, %10, %cst_8 {dimension_numbers = #tpu.dot_dimension_numbers<[1], [0], [0], [1], [0, 0, 1, 1], [], []>} : vector<8x128xbf16>, vector<128x128xbf16>, vector<8x128xf32> -> vector<8x128xf32>
    %c0_9 = arith.constant 0 : index
    %c0_10 = arith.constant 0 : index
    %12 = vector.load %arg5[%c0_9, %c0_10] : memref<1x128xf32, #tpu.memory_space<vmem>>, vector<1x128xf32>
    %13 = vector.broadcast %12 : vector<1x128xf32> to vector<8x128xf32>
    %14 = arith.addf %11, %13 : vector<8x128xf32>
    %cst_11 = arith.constant 0.000000e+00 : f32
    %15 = vector.broadcast %cst_11 : f32 to vector<8x128xf32>
    %16 = arith.maximumf %14, %15 : vector<8x128xf32>
    %c0_12 = arith.constant 0 : index
    %c0_13 = arith.constant 0 : index
    %17 = vector.load %arg6[%c0_12, %c0_13] : memref<1x128xf32, #tpu.memory_space<vmem>>, vector<1x128xf32>
    %18 = vector.broadcast %17 : vector<1x128xf32> to vector<8x128xf32>
    %19 = arith.mulf %16, %18 : vector<8x128xf32>
    %cst_14 = arith.constant dense<0.000000e+00> : vector<8xf32>
    %20 = vector.multi_reduction <add>, %19, %cst_14 [1] : vector<8x128xf32> to vector<8xf32>
    %21 = vector.shape_cast %20 : vector<8xf32> to vector<8x1xf32>
    %c0_15 = arith.constant 0 : index
    %c0_16 = arith.constant 0 : index
    %22 = vector.load %arg7[%c0_15, %c0_16] : memref<1x1xf32, #tpu.memory_space<vmem>>, vector<1x1xf32>
    %23 = vector.broadcast %22 : vector<1x1xf32> to vector<8x1xf32>
    %24 = arith.addf %21, %23 : vector<8x1xf32>
    %c0_17 = arith.constant 0 : index
    %c0_18 = arith.constant 0 : index
    %25 = vector.load %arg8[%c0_17, %c0_18] : memref<8x1xf32, #tpu.memory_space<vmem>>, vector<8x1xf32>
    tpu.vector_store %arg8[%c0_17, %c0_18], %24 {strides = array<i32>} : memref<8x1xf32, #tpu.memory_space<vmem>>, vector<8x1xf32>,
    return
  }
  func.func @transform_0(%arg0: i32) -> (i32, i32) {
    %c0_i32 = arith.constant 0 : i32
    %c0_i32_0 = arith.constant 0 : i32
    return %arg0, %c0_i32 : i32, i32
  }
  func.func @transform_1(%arg0: i32) -> (i32, i32) {
    %c0_i32 = arith.constant 0 : i32
    %c0_i32_0 = arith.constant 0 : i32
    %c0_i32_1 = arith.constant 0 : i32
    return %c0_i32, %c0_i32_0 : i32, i32
  }
  func.func @transform_2(%arg0: i32) -> (i32, i32) {
    %c0_i32 = arith.constant 0 : i32
    %c0_i32_0 = arith.constant 0 : i32
    %c0_i32_1 = arith.constant 0 : i32
    return %c0_i32, %c0_i32_0 : i32, i32
  }
  func.func @transform_3(%arg0: i32) -> (i32, i32) {
    %c0_i32 = arith.constant 0 : i32
    %c0_i32_0 = arith.constant 0 : i32
    %c0_i32_1 = arith.constant 0 : i32
    return %c0_i32, %c0_i32_0 : i32, i32
  }
  func.func @transform_4(%arg0: i32) -> (i32, i32) {
    %c0_i32 = arith.constant 0 : i32
    %c0_i32_0 = arith.constant 0 : i32
    %c0_i32_1 = arith.constant 0 : i32
    return %c0_i32, %c0_i32_0 : i32, i32
  }
  func.func @transform_5(%arg0: i32) -> (i32, i32) {
    %c0_i32 = arith.constant 0 : i32
    %c0_i32_0 = arith.constant 0 : i32
    %c0_i32_1 = arith.constant 0 : i32
    return %c0_i32, %c0_i32_0 : i32, i32
  }
  func.func @transform_6(%arg0: i32) -> (i32, i32) {
    %c0_i32 = arith.constant 0 : i32
    %c0_i32_0 = arith.constant 0 : i32
    %c0_i32_1 = arith.constant 0 : i32
    return %c0_i32, %c0_i32_0 : i32, i32
  }
  func.func @transform_7(%arg0: i32) -> (i32, i32) {
    %c0_i32 = arith.constant 0 : i32
    %c0_i32_0 = arith.constant 0 : i32
    return %arg0, %c0_i32 : i32, i32
  }
}

</mosaic_0001>

<bundles_post_ra>
// kernel: tpu_custom_call.1
= control target key start
LH: loop header
LB: loop body
LE: loop exit
PB: predicated region body
PF: predicated region fallthrough
CT: control target
= control target key end

     0   :  { %s422_s0 = inlined_call_operand.hbm [shape: f32[8,32], index: 0, kind: input, shape index: {}]   ;;  %s423_s1 = inlined_call_operand.hbm [shape: bf16[32,128], index: 1, kind: input, shape index: {}]   ;;  %s424_s2 = inlined_call_operand.vmem [shape: f32[1,128], index: 2, kind: input, shape index: {}]   ;;  %s425_s3 = inlined_call_operand.hbm [shape: bf16[128,128], index: 3, kind: input, shape index: {}]   ;;  %s426_s4 = inlined_call_operand.vmem [shape: f32[1,128], index: 4, kind: input, shape index: {}]   ;;  %s427_s5 = inlined_call_operand.vmem [shape: f32[1,128], index: 5, kind: input, shape index: {}]   ;;  %s428_s6 = inlined_call_operand.<no memory space> [shape: f32[1,1], index: 6, kind: input, shape index: {}]   ;;  %s429_s7 = inlined_call_operand.vmem [shape: f32[8,1], index: 7, kind: output, shape index: {}]  }
   0x1   :  { %v12_v0 = vstv %s428_s6 }
   0x2   :  { %13 = vst [vmem:[#allocation2] sm:$0x1] %v12_v0 }
   0x3   :  { %14 = vsyncpa [#allocation4], 0 }
   0x4   :  { %15 = vsyncpa [#allocation6], 0  ;;  %s31_s28 = sshll.u32 %s423_s1, 4  ;;  %s353_s29 = smov [#allocation5]   ;;  %s32_s28 = int_to_ptr.hbm [resolvable:$true] %s31_s28 }
   0x5   :  { %s33_s30 = sshll.u32 %s353_s29, 4  ;;  %s21_s10 = sshll.u32 %s422_s0, 4  ;;  %s34_s30 = int_to_ptr.vmem [resolvable:$true] %s33_s30  ;;  %s22_s10 = int_to_ptr.hbm [resolvable:$true] %s21_s10 }
   0x6   :  { %s354_s11 = smov 64   ;;  %s355_s12 = smov 4  }
   0x7   :  { %39 = dma.hbm_to_vmem [thread:$0]  %s32_s28, 256, %s34_s30, [#allocation6], %s354_s11, %s354_s11, %s355_s12  }
   0x8   :  { %s356_s6 = smov [#allocation3]   ;;  %s46_s16 = sshll.u32 %s425_s3, 4  ;;  %s47_s16 = int_to_ptr.hbm [resolvable:$true] %s46_s16 }
   0x9   :  { %s23_s13 = sshll.u32 %s356_s6, 4  ;;  %s357_s1 = smov [#allocation7]   ;;  %s24_s13 = int_to_ptr.vmem [resolvable:$true] %s23_s13 }
   0xa   :  { %26 = dma.hbm_to_vmem [thread:$0]  %s22_s10, 128, %s24_s13, [#allocation4]  }
   0xb   :  { %s48_s17 = sshll.u32 %s357_s1, 4  ;;  %s49_s17 = int_to_ptr.vmem [resolvable:$true] %s48_s17 }
   0xc   :  { %54 = dma.hbm_to_vmem [thread:$0]  %s47_s16, 1024, %s49_s17, [#allocation6], %s354_s11, %s354_s11, %s355_s12  }
   0xd   :  { %349 = dma.done.wait [#allocation4], 128  }
   0xe   :  { %350 = vsyncadd [#allocation4], 4294967168 }
   0xf   :  { %351 = dma.done.wait [#allocation6], 1280  }
  0x10   :  { %352 = vsyncadd [#allocation6], 4294966016  ;;  %v259_v1 = vld [vmem:[#allocation5 + $0x8] sm:$0xff]  ;;  %v258_v3 = vld [vmem:[#allocation5] sm:$0xff]  ;;  %vm96_vm0 = vcmask 261120   ;;  %vm209_vm1 = vcmask 7168  }
  0x11   :  { %v267_v2 = vld [vmem:[#allocation7 + $0x38] sm:$0xff]  ;;  %106 = vmatpush.bf16.msra.mxu0 %v259_v1  ;;  %v74_v4 = vld [vmem:[#allocation3] sm:$0xff]  ;;  %v266_v5 = vld [vmem:[#allocation7 + $0x30] sm:$0xff] }
  0x12   :  { %183 = vmatpush.bf16.msra.mxu1 %v267_v2  ;;  %v75_v6 = vpack.c.bf16 %v74_v4, %v74_v4  ;;  %v265_v7 = vld [vmem:[#allocation7 + $0x28] sm:$0xff]  ;;  %v264_v8 = vld [vmem:[#allocation7 + $0x20] sm:$0xff]  ;;  %v263_v9 = vld [vmem:[#allocation7 + $0x18] sm:$0xff] }
  0x13   :  { %v262_v10 = vld [vmem:[#allocation7 + $0x10] sm:$0xff]  ;;  %v261_v11 = vld [vmem:[#allocation7 + $0x8] sm:$0xff]  ;;  %v260_v12 = vld [vmem:[#allocation7] sm:$0xff] }
  0x14   :  { %v273_v13 = vld [vmem:[%s424_s2] ss:$0 sm:$0xff] }
  0x15   :  { %107 = vmatpush.bf16.msra.mxu0 %v258_v3  ;;  %v274_v19 = vld [vmem:[%s426_s4] ss:$0 sm:$0xff] }
  0x16   :  { %184 = vmatpush.bf16.msra.mxu1 %v266_v5  ;;  %v275_v22 = vld [vmem:[%s427_s5] ss:$0 sm:$0xff] }
  0x17   :  { %v276_v26 = vld [vmem:[#allocation2] ss:$0 sm:$0xff] }
  0x18   :  { %225 = vmatmul.msk.bf16.vlgmr.msra.gmra.mxu0 %vm96_vm0, %v75_v6 }
  0x1a   :  { %185 = vmatpush.bf16.msra.mxu1 %v265_v7 }
  0x1e   :  { %186 = vmatpush.bf16.msra.mxu1 %v264_v8 }
  0x22   :  { %187 = vmatpush.bf16.msra.mxu1 %v263_v9 }
  0x26   :  { %188 = vmatpush.bf16.msra.mxu1 %v262_v10 }
  0x2a   :  { %189 = vmatpush.bf16.msra.mxu1 %v261_v11 }
  0x2e   :  { %190 = vmatpush.bf16.msra.mxu1 %v260_v12 }
  0x95   :  { %v109_v14 = vpop.f32.mrf.mxu0 }
  0x96   :  { %v110_v15 = vadd.f32 %v273_v13, %v109_v14 }
  0x98   :  { %v113_v16 = vmax.f32 %v110_v15, 0.0 }
  0x9a   :  { %v114_v17 = vpack.c.bf16 %v113_v16, %v113_v16 }
  0x9c   :  { %191 = vmatmul.bf16.vlgmr.msra.gmra.mxu1 %v114_v17 }
  0x9d   :  { %v111_v18 = vpop.f32.mrf.mxu0 }
 0x119   :  { %v192_v20 = vpop.f32.mrf.mxu1 }
 0x11a   :  { %v193_v21 = vadd.f32 %v274_v19, %v192_v20 }
 0x11c   :  { %v196_v23 = vmax.f32 %v193_v21, 0.0 }
 0x11e   :  { %v201_v24 = vmul.f32 %v275_v22, %v196_v23 }
 0x120   :  { %202 = vadd.xlane.f32.xlu0 %v201_v24 }
 0x121   :  { %v194_v25 = vpop.f32.mrf.mxu1 }
 0x193   :  { %v203_v27 = vpop.xlane.xlu0 %202 }
 0x194   :  { %v208_v28 = vadd.f32 %v276_v26, %v203_v27 }
 0x196   :  { %210 = vst.msk [vmem:[%s429_s7] sm:$0xff] %vm209_vm1, %v208_v28 }
 0x197   :  { %215 = vsyncpa [#allocation4], 1 }
 0x198   :  { %216 = vsyncpa [#allocation6], 1 }

</bundles_post_ra>
